<compile_context>
chip_gen: v6e
topology: v6e:2x2x1
jax: 0.10.0
libtpu: 0.0.40
codegen_flags: <defaults>
</compile_context>

<pallas_src>
import functools

import jax
import jax.numpy as jnp
from jax.experimental import pallas as pl
from jax.experimental.pallas import tpu as pltpu


def _round_up(a: int, b: int) -> int:
    return ((a + b - 1) // b) * b


def _cdiv(a: int, b: int) -> int:
    return -(-a // b)


def _next_pow2(n: int) -> int:
    p = 1
    while p < n:
        p *= 2
    return p


def _cnn_actor_kernel(x_ref, s_ref, b_ref, o_ref):
    # x_ref: [TMP, L]  packed rows (G original rows per packed row, L = G*Fp)
    # s_ref: [L, G]    block-diagonal weight matrix, bf16 (conv weight folded in)
    # b_ref: SMEM [1]  conv bias scalar (f32)
    # o_ref: [TMP, G]  out[r, g] = logit of original row r*G + g
    x = x_ref[...].astype(jnp.bfloat16)  # single-pass MXU operand (no bf16x3)
    acc = jnp.dot(x, s_ref[...], preferred_element_type=jnp.float32)
    acc = acc + b_ref[0]
    o_ref[...] = jnp.maximum(acc, 0.0).astype(o_ref.dtype)


def _pick_tile(mp: int, block_rows: int) -> int:
    """Packed-row tile: large enough to amortize per-step overhead, but keep
    >= 2 (and preferably an even number of) grid steps so v7x's two
    TensorCores split the row axis evenly."""
    if mp <= 8:
        return mp  # single block == whole (tiny) array
    tmp = min(block_rows, _round_up(mp, 8))
    steps = _cdiv(mp, tmp)
    if steps % 2 == 1:
        tmp = _round_up(_cdiv(mp, steps + 1), 8)
    return tmp


@functools.partial(jax.jit, static_argnames=("block_rows",))
def cnn_actor_forward(x_nchw, conv_weight, conv_bias, *, block_rows=4096):
    """x_nchw: [B, 1, H, F]; conv_weight: [1, 1, 1, F]; conv_bias: [1]."""
    B, C, H, F = x_nchw.shape
    assert C == 1
    M = B * H
    dtype = x_nchw.dtype

    # Lane packing: G consecutive rows share one 128-lane (or L-lane) row.
    # If F does not divide 128, pad each row's features to the next power of
    # two (<= 128) so the packed layout stays lane-dense; F > 128 rounds up to
    # a multiple of 128 (G = 1, still lane-dense).
    if 128 % F == 0:
        Fp = F
    elif F < 128:
        Fp = _next_pow2(F)
    else:
        Fp = _round_up(F, 128)
    G = max(128 // Fp, 1)
    L = G * Fp

    mp = _cdiv(M, G)                      # packed rows (no tile round-up)
    tmp = _pick_tile(mp, block_rows)
    grid = (_cdiv(mp, tmp),)              # ragged last block handled by Pallas

    # [B,1,H,F] -> [M,F] is a free contiguous reshape; only pad the <= G-1
    # remainder rows and the Fp-F feature lanes (skipped when already aligned).
    x2 = x_nchw.reshape(M, F)
    row_pad = (-M) % G
    feat_pad = Fp - F
    if row_pad or feat_pad:
        x2 = jnp.pad(x2, ((0, row_pad), (0, feat_pad)))
    xp = x2.reshape(mp, L)                # free contiguous reshape

    # Block-diagonal selector with the conv weight folded in (bf16 so the MXU
    # runs a single pass):  S[g*Fp + k, g] = w[k]  ->  (xp @ S)[r, g] = <row, w>
    w = conv_weight.reshape(F).astype(jnp.float32)
    if feat_pad:
        w = jnp.pad(w, (0, feat_pad))
    s_mat = (jnp.eye(G, dtype=jnp.float32)[:, None, :]
             * w[None, :, None]).reshape(L, G).astype(jnp.bfloat16)

    b_smem = conv_bias.reshape(1).astype(jnp.float32)

    out_itemsize = jnp.dtype(dtype).itemsize
    cost = pl.CostEstimate(
        flops=2 * M * Fp + 2 * M,
        transcendentals=0,
        bytes_accessed=(xp.size * jnp.dtype(xp.dtype).itemsize
                        + mp * G * out_itemsize
                        + s_mat.size * jnp.dtype(s_mat.dtype).itemsize),
    )

    out = pl.pallas_call(
        _cnn_actor_kernel,
        out_shape=jax.ShapeDtypeStruct((mp, G), dtype),
        grid=grid,
        in_specs=[
            pl.BlockSpec((tmp, L), lambda i: (i, 0)),            # streamed rows
            pl.BlockSpec((L, G), lambda i: (0, 0)),              # resident weights
            pl.BlockSpec(memory_space=pltpu.MemorySpace.SMEM),   # scalar bias
        ],
        out_specs=pl.BlockSpec((tmp, G), lambda i: (i, 0)),
        compiler_params=pltpu.CompilerParams(
            dimension_semantics=("parallel",),
            vmem_limit_bytes=32 * 1024 * 1024,
        ),
        cost_estimate=cost,
    )(xp, s_mat, b_smem)

    # Unpack: out[r, g] -> original row r*G + g; drop padded tail; -> [B, H].
    flat = out.reshape(mp * G)
    if mp * G != M:
        flat = flat[:M]
    return flat.reshape(B, H)


def _reference(x, conv_weight, conv_bias):
    F = x.shape[-1]
    return jnp.maximum(
        jnp.einsum("bhf,f->bh",
                   x[:, 0, :, :].astype(jnp.float32),
                   conv_weight.reshape(F).astype(jnp.float32))
        + conv_bias[0],
        0.0,
    )


def _bf16_grid(a):
    # Round test data to the bf16 grid so the check is insensitive to the
    # kernel's bf16 MXU operands (products of bf16-exact values are f32-exact).
    return a.astype(jnp.bfloat16).astype(jnp.float32)


if __name__ == "__main__":
    key = jax.random.PRNGKey(0)
    k_x, k_w, k_b, k_x2, k_x3, k_w3 = jax.random.split(key, 6)

    # --- Test 1: small shapes consistent with the module (feature_dim=16, H=8).
    B, H, feature_dim = 2, 8, 16
    x = _bf16_grid(jax.random.normal(k_x, (B, 1, H, feature_dim), dtype=jnp.float32))
    conv_weight = _bf16_grid(
        jax.random.normal(k_w, (1, 1, 1, feature_dim), dtype=jnp.float32) * 0.1)
    conv_bias = jax.random.normal(k_b, (1,), dtype=jnp.float32) * 0.1

    logits = jax.block_until_ready(cnn_actor_forward(x, conv_weight, conv_bias))
    ref = _reference(x, conv_weight, conv_bias)
    assert logits.shape == (B, H), logits.shape
    assert jnp.allclose(logits, ref, atol=1e-4, rtol=1e-4), \
        float(jnp.max(jnp.abs(logits - ref)))

    # --- Test 2: large, M % G == 0 (no wrapper pad), multi-step grid with a
    # ragged last block (mp = 3000 -> 2 steps of 1504 packed rows).
    B2, H2 = 8, 3000
    x_big = _bf16_grid(jax.random.normal(k_x2, (B2, 1, H2, feature_dim), dtype=jnp.float32))
    logits_big = jax.block_until_ready(cnn_actor_forward(x_big, conv_weight, conv_bias))
    ref_big = _reference(x_big, conv_weight, conv_bias)
    assert logits_big.shape == (B2, H2), logits_big.shape
    assert jnp.allclose(logits_big, ref_big, atol=1e-4, rtol=1e-4), \
        float(jnp.max(jnp.abs(logits_big - ref_big)))

    # --- Test 3: 128 % F != 0 path (F=20 -> padded to 32 lanes, G=4) plus a
    # remainder row pad (M = 150, M % G = 2).
    B3, H3, F3 = 3, 50, 20
    x_odd = _bf16_grid(jax.random.normal(k_x3, (B3, 1, H3, F3), dtype=jnp.float32))
    w_odd = _bf16_grid(jax.random.normal(k_w3, (1, 1, 1, F3), dtype=jnp.float32) * 0.1)
    logits_odd = jax.block_until_ready(cnn_actor_forward(x_odd, w_odd, conv_bias))
    ref_odd = _reference(x_odd, w_odd, conv_bias)
    assert logits_odd.shape == (B3, H3), logits_odd.shape
    assert jnp.allclose(logits_odd, ref_odd, atol=1e-4, rtol=1e-4), \
        float(jnp.max(jnp.abs(logits_odd - ref_odd)))

    print("KERNEL_OK")
</pallas_src>

<mosaic_0001>
module attributes {stable_mosaic.version = 11 : i64} {
  func.func @_cnn_actor_kernel(%arg0: i32, %arg1: memref<2x128xf32, #tpu.memory_space<vmem>>, %arg2: memref<128x8xbf16, #tpu.memory_space<vmem>>, %arg3: memref<1xf32, #tpu.memory_space<smem>>, %arg4: memref<2x8xf32, #tpu.memory_space<vmem>>) attributes {dimension_semantics = [#tpu.dimension_semantics<parallel>], iteration_bounds = array<i64: 1>, scalar_prefetch = 0 : i64, scratch_operands = 0 : i64, tpu.core_type = #tpu.core_type<tc>, window_params = [{transform_indices = @transform_0, window_bounds = array<i64: 2, 128>}, {pipeline_mode = #tpu.pipeline_mode<synchronous>, transform_indices = @transform_1, window_bounds = array<i64: 128, 8>}, {transform_indices = @transform_2, window_bounds = array<i64: 1>}, {transform_indices = @transform_3, window_bounds = array<i64: 2, 8>}]} {
    %c0 = arith.constant 0 : index
    %c0_0 = arith.constant 0 : index
    %0 = vector.load %arg1[%c0, %c0_0] : memref<2x128xf32, #tpu.memory_space<vmem>>, vector<2x128xf32>
    %1 = arith.truncf %0 : vector<2x128xf32> to vector<2x128xbf16>
    %c0_1 = arith.constant 0 : index
    %c0_2 = arith.constant 0 : index
    %2 = vector.load %arg2[%c0_1, %c0_2] : memref<128x8xbf16, #tpu.memory_space<vmem>>, vector<128x8xbf16>
    %cst = arith.constant dense<0.000000e+00> : vector<2x8xf32>
    %3 = tpu.matmul %1, %2, %cst {dimension_numbers = #tpu.dot_dimension_numbers<[1], [0], [0], [1], [0, 0, 1, 1], [], []>} : vector<2x128xbf16>, vector<128x8xbf16>, vector<2x8xf32> -> vector<2x8xf32>
    %c0_3 = arith.constant 0 : index
    %4 = memref.load %arg3[%c0_3] : memref<1xf32, #tpu.memory_space<smem>>
    %5 = vector.broadcast %4 : f32 to vector<2x8xf32>
    %6 = arith.addf %3, %5 : vector<2x8xf32>
    %cst_4 = arith.constant 0.000000e+00 : f32
    %7 = vector.broadcast %cst_4 : f32 to vector<2x8xf32>
    %8 = arith.maximumf %6, %7 : vector<2x8xf32>
    %c0_5 = arith.constant 0 : index
    %c0_6 = arith.constant 0 : index
    %9 = vector.load %arg4[%c0_5, %c0_6] : memref<2x8xf32, #tpu.memory_space<vmem>>, vector<2x8xf32>
    tpu.vector_store %arg4[%c0_5, %c0_6], %8 {strides = array<i32>} : memref<2x8xf32, #tpu.memory_space<vmem>>, vector<2x8xf32>,
    return
  }
  func.func @transform_0(%arg0: i32) -> (i32, i32) {
    %c0_i32 = arith.constant 0 : i32
    %c0_i32_0 = arith.constant 0 : i32
    return %arg0, %c0_i32 : i32, i32
  }
  func.func @transform_1(%arg0: i32) -> (i32, i32) {
    %c0_i32 = arith.constant 0 : i32
    %c0_i32_0 = arith.constant 0 : i32
    %c0_i32_1 = arith.constant 0 : i32
    return %c0_i32, %c0_i32_0 : i32, i32
  }
  func.func @transform_2(%arg0: i32) -> i32 {
    %c0_i32 = arith.constant 0 : i32
    %c0_i32_0 = arith.constant 0 : i32
    return %c0_i32 : i32
  }
  func.func @transform_3(%arg0: i32) -> (i32, i32) {
    %c0_i32 = arith.constant 0 : i32
    %c0_i32_0 = arith.constant 0 : i32
    return %arg0, %c0_i32 : i32, i32
  }
}

</mosaic_0001>

<bundles_post_ra>
// kernel: cnn_actor_forward.1
= control target key start
LH: loop header
LB: loop body
LE: loop exit
PB: predicated region body
PF: predicated region fallthrough
CT: control target
= control target key end

     0   :  { %v212_v1 = vmov 0.0   ;;  %vm213_vm0 = vmmov 0   ;;  %s268_s0 = inlined_call_operand.vmem [shape: f32[2,128], index: 0, kind: input, shape index: {}]   ;;  %s269_s1 = inlined_call_operand.vmem [shape: bf16[128,8], index: 1, kind: input, shape index: {}]   ;;  %s270_s2 = inlined_call_operand.<no memory space> [shape: f32[1], index: 2, kind: input, shape index: {}]   ;;  %s271_s3 = inlined_call_operand.hbm [shape: f32[2,8], index: 3, kind: output, shape index: {}]  }
   0x1   :  { %v182_v0 = vld [vmem:[%s269_s1 + $0x38] sm:$0xff]   ;;  %159 = vmatprep.subr.bf16.mxu0 %v212_v1  ;;  %v183_v2 = vld [vmem:[%s269_s1 + $0x30] sm:$0xff]   ;;  %175 = vmatprep.mubr.msk.bf16.mxu0 %vm213_vm0, %v212_v1  ;;  %v184_v3 = vld [vmem:[%s269_s1 + $0x28] sm:$0xff]  }
   0x2   :  { %160 = vmatpush3.bf16.msra.mxu0 %v182_v0 }
   0x3   :  { %161 = vmatprep.subr.bf16.mxu0 %v212_v1 }
   0x6   :  { %162 = vmatpush3.bf16.msra.mxu0 %v183_v2 }
   0x7   :  { %163 = vmatprep.subr.bf16.mxu0 %v212_v1 }
   0x8   :  { %9 = vsyncpa [#allocation4], 0  ;;  %v185_v4 = vld [vmem:[%s269_s1 + $0x20] sm:$0xff]   ;;  %v186_v5 = vld [vmem:[%s269_s1 + $0x18] sm:$0xff]   ;;  %v36_v11 = vstv %s270_s2  ;;  %s214_s5 = smov [#allocation3]   ;;  %vm126_vm1 = vcmask 58368  }
   0x9   :  { %v187_v6 = vld [vmem:[%s269_s1 + $0x10] sm:$0xff]   ;;  %v188_v7 = vld [vmem:[%s269_s1 + $0x8] sm:$0xff]   ;;  %v189_v8 = vld [vmem:[%s269_s1] sm:$0xff]   ;;  %s134_s6 = sshll.u32 %s214_s5, 4  ;;  %s135_s6 = int_to_ptr.vmem [resolvable:$true] %s134_s6 }
   0xa   :  { %164 = vmatpush3.bf16.msra.mxu0 %v184_v3  ;;  %v17_v9 = vld [vmem:[%s268_s0] sm:$0x3]  ;;  %s190_s0 = scalar_lea.vmem %s135_s6, 32  ;;  %p195_p1 = scmp.lt.s32.totalorder %s135_s6, %s135_s6 }
   0xb   :  { %165 = vmatprep.subr.bf16.mxu0 %v212_v1  ;;  %v18_v10 = vpack.c.bf16 %v17_v9, %v17_v9  ;;  %p191_p0 = scmp.ne.s32.totalorder %s135_s6, %s190_s0  ;;  %p196_p2 = scmp.lt.s32.totalorder %s190_s0, %s190_s0 }
   0xd   :  { %p197_p3 = por %p196_p2, %p195_p1 }
   0xe   :  { %166 = vmatpush3.bf16.msra.mxu0 %v185_v4 }
   0xf   :  { %167 = vmatprep.subr.bf16.mxu0 %v212_v1  ;;  %p198_p4 = pnand %p197_p3, %p191_p0 }
  0x12   :  { %168 = vmatpush3.bf16.msra.mxu0 %v186_v5 }
  0x13   :  { %169 = vmatprep.subr.bf16.mxu0 %v212_v1 }
  0x16   :  { %170 = vmatpush3.bf16.msra.mxu0 %v187_v6 }
  0x17   :  { %171 = vmatprep.subr.bf16.mxu0 %v212_v1 }
  0x1a   :  { %172 = vmatpush3.bf16.msra.mxu0 %v188_v7 }
  0x1b   :  { %173 = vmatprep.subr.bf16.mxu0 %v212_v1 }
  0x1e   :  { %174 = vmatpush3.bf16.msra.mxu0 %v189_v8 }
  0x21   :  { %176 = vmatmul.mubr.bf16.vlgmr.msra.gmra.mxu0 %v18_v10 }
  0xe1   :  { %v119_v12 = vpop.f32.mrf.mxu0 }
  0xe2   :  { %v120_v13 = vadd.f32 %v119_v12, %v36_v11 }
  0xe3   :  { %v177_v14 = vpop.f32.mrf.mxu0 }
  0xe4   :  { %v125_v15 = vmax.f32 %v120_v13, 0.0 }
  0xe5   :  { %v122_v16 = vpop.f32.mrf.mxu0 }
  0xe6   :  { %127 = vst.msk [vmem:[#allocation3] sm:$0x3] %vm126_vm1, %v125_v15 }
  0xe7   :  { %v178_v17 = vpop.f32.mrf.mxu0 }
  0xe8   :  { %201 = shalt.err (!%p198_p4)
}
  0xe9   :  { %137 = dma.vmem_to_hbm [thread:$0]  %s135_s6, 32, %s271_s3, [#allocation4]  }
  0xea   :  { %210 = dma.done.wait [#allocation4], 32  }
  0xeb   :  { %211 = vsyncadd [#allocation4], 4294967264 }
  0xec   :  { %141 = vsyncpa [#allocation4], 1 }

</bundles_post_ra>
